<compile_context>
chip_gen: v6e
topology: v6e:2x2x1
jax: 0.10.0
libtpu: 0.0.40
codegen_flags: <defaults>
</compile_context>

<pallas_src>
import functools

import jax
import jax.numpy as jnp
from jax.experimental import pallas as pl
from jax.experimental.pallas import tpu as pltpu


def _round_up(x, m):
    return (x + m - 1) // m * m


def _interp_matrix_align_corners(out_size, in_size, dtype=jnp.float32):
    """Row-stochastic (out_size, in_size) bilinear matrix, align_corners=True."""
    if out_size == 1:
        src = jnp.zeros((1,), dtype)
    else:
        scale = (in_size - 1) / (out_size - 1)
        src = jnp.arange(out_size, dtype=dtype) * jnp.asarray(scale, dtype)
    i0 = jnp.clip(jnp.floor(src).astype(jnp.int32), 0, in_size - 1)
    i1 = jnp.clip(i0 + 1, 0, in_size - 1)
    frac = src - i0.astype(dtype)
    return ((1.0 - frac)[:, None] * jax.nn.one_hot(i0, in_size, dtype=dtype)
            + frac[:, None] * jax.nn.one_hot(i1, in_size, dtype=dtype))


# -----------------------------------------------------------------------------
# Pallas kernel: fused bilinear upsample (align_corners=True) + masked softmax
# cross-entropy partial sums for one (image, row-tile) grid step, both DSN heads.
# -----------------------------------------------------------------------------
def _dsn_ce_kernel(pred_ref, ah_ref, aw_ref, tgt_ref,      # inputs
                   part_ref, cnt_ref,                        # outputs (accumulators)
                   hs_ref,                                   # VMEM scratch
                   *, ignore_index, n_heads, num_classes, w_pad):
    t = pl.program_id(1)

    # First row-tile of this image: zero the resident accumulators and hoist the
    # horizontal interpolation (pred[n, head, c] @ Aw) into hs_ref once per image.
    @pl.when(t == 0)
    def _init():
        part_ref[...] = jnp.zeros_like(part_ref)
        cnt_ref[...] = jnp.zeros_like(cnt_ref)
        aw = aw_ref[...]                                   # (wp, Wp)
        for head in range(n_heads):
            for c in range(num_classes):
                v = jnp.dot(pred_ref[0, head * num_classes + c], aw,
                            preferred_element_type=jnp.float32)
                hs_ref[head, :, c * w_pad:(c + 1) * w_pad] = v.astype(hs_ref.dtype)

    ah = ah_ref[...]                                       # (TH, hp) vertical weights
    tgt = tgt_ref[0]                                       # (TH, Wp) int32 labels
    th = tgt.shape[0]
    valid = tgt != ignore_index

    # Valid-pixel count partial (shared by both heads): fold sublane groups with
    # pure VALU adds, accumulate into the lane-dense (8, Wp) resident output block.
    vcnt = jnp.where(valid, 1.0, 0.0).astype(jnp.float32)
    blk = vcnt[0:8]
    for r in range(1, th // 8):
        blk = blk + vcnt[r * 8:(r + 1) * 8]
    cnt_ref[0] += blk

    for head in range(n_heads):
        # Single lane-dense MXU matmul: all class maps for this tile at once.
        up_all = jnp.dot(ah, hs_ref[head],
                         preferred_element_type=jnp.float32)   # (TH, C*Wp) f32

        # Pass 1: running max over classes + target-class logit (select, no add).
        up0 = up_all[:, 0:w_pad]
        m = up0
        zt = jnp.where(tgt == 0, up0, 0.0)
        for c in range(1, num_classes):
            up_c = up_all[:, c * w_pad:(c + 1) * w_pad]
            m = jnp.maximum(m, up_c)
            zt = jnp.where(tgt == c, up_c, zt)

        # Pass 2: one exp per pixel-class, no rescale.
        s = jnp.exp(up0 - m)
        for c in range(1, num_classes):
            s = s + jnp.exp(up_all[:, c * w_pad:(c + 1) * w_pad] - m)

        lse = m + jnp.log(s)
        per_pix = jnp.where(valid, lse - zt, 0.0)

        blk = per_pix[0:8]
        for r in range(1, th // 8):
            blk = blk + per_pix[r * 8:(r + 1) * 8]
        part_ref[0, head * 8:(head + 1) * 8] += blk


# -----------------------------------------------------------------------------
# Wrapper
# -----------------------------------------------------------------------------
def upsample_ce_partial_sums(preds, target, *, ignore_index=255, tile_h=128,
                             mxu_dtype=jnp.bfloat16):
    """preds: (N, n_heads, C, hp, wp) logits; target: (N, H, W) int labels.

    Returns (loss_sums, counts):
      loss_sums (N, n_heads): sum over valid pixels of CE(upsample_ac(pred), target)
      counts    (N,):         number of non-ignored pixels per image.
    """
    n, n_heads, c, hp, wp = preds.shape
    nt, h, w = target.shape
    assert nt == n

    compute_dtype = jnp.dtype(mxu_dtype)

    # tile_h is the M dim of every matmul; keep it a multiple of 8 and <= H rounded.
    # (128 is a good default for v5e/v7x; v6e can use 256.)
    tile_h = max(8, _round_up(min(tile_h, _round_up(h, 8)), 8))
    h_pad = _round_up(h, tile_h)
    w_pad = _round_up(w, 128)                       # lane-dense width

    ah = _interp_matrix_align_corners(h, hp)        # (H, hp)
    ah = jnp.pad(ah, ((0, h_pad - h), (0, 0))).astype(compute_dtype)
    aw = _interp_matrix_align_corners(w, wp).T      # (wp, W)
    aw = jnp.pad(aw, ((0, 0), (0, w_pad - w))).astype(compute_dtype)

    tgt = jnp.pad(target.astype(jnp.int32),
                  ((0, 0), (0, h_pad - h), (0, w_pad - w)),
                  constant_values=ignore_index)     # padded pixels are ignored

    pred_flat = preds.reshape(n, n_heads * c, hp, wp).astype(compute_dtype)

    grid = (n, h_pad // tile_h)
    kernel = functools.partial(_dsn_ce_kernel, ignore_index=ignore_index,
                               n_heads=n_heads, num_classes=c, w_pad=w_pad)

    # Explicit VMEM budget (review): resident pred + hscratch + up_all live value
    # + double-buffered streamed tiles + accumulators, with 2x headroom; capped to
    # stay within v7x's 64 MiB physical VMEM.
    isz = compute_dtype.itemsize
    est = (2 * n_heads * c * hp * wp * isz            # pred block (x2 buffers)
           + 2 * tile_h * hp * isz                    # ah tiles
           + wp * w_pad * isz                         # aw (constant)
           + 2 * tile_h * w_pad * 4                   # target tiles
           + n_heads * hp * c * w_pad * isz           # hscratch
           + tile_h * c * w_pad * 4                   # up_all live value
           + (n_heads + 1) * 8 * w_pad * 4)           # output accumulators
    vmem_limit = int(min(max(2 * est, 32 * 2 ** 20), 56 * 2 ** 20))

    part, cnt = pl.pallas_call(
        kernel,
        out_shape=(jax.ShapeDtypeStruct((n, n_heads * 8, w_pad), jnp.float32),
                   jax.ShapeDtypeStruct((n, 8, w_pad), jnp.float32)),
        grid_spec=pltpu.PrefetchScalarGridSpec(
            num_scalar_prefetch=0,
            grid=grid,
            in_specs=[
                # full low-res prediction for image i (both heads): resident over t
                pl.BlockSpec((1, n_heads * c, hp, wp), lambda i, t: (i, 0, 0, 0)),
                # vertical interpolation rows for this tile
                pl.BlockSpec((tile_h, hp), lambda i, t: (t, 0)),
                # horizontal interpolation matrix (constant)
                pl.BlockSpec((wp, w_pad), lambda i, t: (0, 0)),
                # target rows for this tile
                pl.BlockSpec((1, tile_h, w_pad), lambda i, t: (i, t, 0)),
            ],
            out_specs=[
                # lane-dense per-head loss partial sums, resident accumulator over t
                pl.BlockSpec((1, n_heads * 8, w_pad), lambda i, t: (i, 0, 0)),
                # lane-dense valid-pixel count partial sums
                pl.BlockSpec((1, 8, w_pad), lambda i, t: (i, 0, 0)),
            ],
            scratch_shapes=[
                # hoisted horizontal interpolation, laid out for one big matmul/tile
                pltpu.VMEM((n_heads, hp, c * w_pad), compute_dtype),
            ],
        ),
        compiler_params=pltpu.CompilerParams(
            dimension_semantics=("parallel", "arbitrary"),
            vmem_limit_bytes=vmem_limit),
    )(pred_flat, ah, aw, tgt)

    loss_sums = part.reshape(n, n_heads, 8, w_pad).sum(axis=(2, 3))   # (N, n_heads)
    counts = cnt.sum(axis=(1, 2))                                     # (N,)
    return loss_sums, counts


def criterion_dsn(preds, target, *, ignore_index=255, mxu_dtype=jnp.bfloat16):
    """loss = CE(up(preds[0])) + 0.4 * CE(up(preds[1])), mean over valid pixels."""
    p0, p1 = preds[0], preds[1]
    if p0.shape == p1.shape:
        # Fused: both heads share the target stream, ah/aw and grid overhead.
        stacked = jnp.stack([p0, p1], axis=1)                # (N, 2, C, hp, wp)
        loss_sums, counts = upsample_ce_partial_sums(
            stacked, target, ignore_index=ignore_index, mxu_dtype=mxu_dtype)
        total = jnp.sum(counts)
        loss0 = jnp.sum(loss_sums[:, 0]) / total
        loss1 = jnp.sum(loss_sums[:, 1]) / total
    else:
        ls0, c0 = upsample_ce_partial_sums(p0[:, None], target,
                                           ignore_index=ignore_index,
                                           mxu_dtype=mxu_dtype)
        ls1, c1 = upsample_ce_partial_sums(p1[:, None], target,
                                           ignore_index=ignore_index,
                                           mxu_dtype=mxu_dtype)
        loss0 = jnp.sum(ls0) / jnp.sum(c0)
        loss1 = jnp.sum(ls1) / jnp.sum(c1)
    return loss0 + 0.4 * loss1


# -----------------------------------------------------------------------------
# Pure-JAX reference (same interpolation matrices) for a sanity check
# -----------------------------------------------------------------------------
def _reference_criterion_dsn(preds, target, *, ignore_index=255):
    def one(pred):
        _, c, hp, wp = pred.shape
        h, w = target.shape[1], target.shape[2]
        ah = _interp_matrix_align_corners(h, hp)
        aw = _interp_matrix_align_corners(w, wp)
        up = jnp.einsum('yh,nchw,xw->ncyx', ah, pred.astype(jnp.float32), aw)
        logits = jnp.transpose(up, (0, 2, 3, 1)).reshape(-1, c)
        t = target.reshape(-1)
        valid = t != ignore_index
        tc = jnp.clip(t, 0, c - 1)
        lse = jax.nn.logsumexp(logits, axis=-1)
        zt = jnp.take_along_axis(logits, tc[:, None], axis=-1)[:, 0]
        per = jnp.where(valid, lse - zt, 0.0)
        return jnp.sum(per) / jnp.sum(valid)
    return one(preds[0]) + 0.4 * one(preds[1])


if __name__ == "__main__":
    batch, num_classes = 2, 4
    hp = wp = 8          # low-res DSN prediction size
    H = W = 16           # target size (upsample 8x8 -> 16x16)
    ignore_index = 255

    key = jax.random.PRNGKey(0)
    k1, k2, k3, k4 = jax.random.split(key, 4)
    pred1 = jax.random.normal(k1, (batch, num_classes, hp, wp), dtype=jnp.float32)
    pred2 = jax.random.normal(k2, (batch, num_classes, hp, wp), dtype=jnp.float32)
    labels = jax.random.randint(k3, (batch, H, W), 0, num_classes, dtype=jnp.int32)
    ignore_mask = jax.random.uniform(k4, (batch, H, W)) < 0.1
    target = jnp.where(ignore_mask, ignore_index, labels).astype(jnp.int32)

    ref = _reference_criterion_dsn((pred1, pred2), target, ignore_index=ignore_index)

    # Exact-parity check: f32 MXU inputs.
    loss_f32 = jax.jit(functools.partial(
        criterion_dsn, ignore_index=ignore_index, mxu_dtype=jnp.float32))(
            (pred1, pred2), target)
    jax.block_until_ready(loss_f32)

    # Fast default path: bf16 MXU inputs with f32 accumulation.
    loss_bf16 = jax.jit(functools.partial(
        criterion_dsn, ignore_index=ignore_index, mxu_dtype=jnp.bfloat16))(
            (pred1, pred2), target)
    jax.block_until_ready(loss_bf16)

    assert loss_f32.shape == () and loss_bf16.shape == ()
    assert bool(jnp.isfinite(loss_f32)) and bool(jnp.isfinite(loss_bf16))
    assert bool(jnp.allclose(loss_f32, ref, rtol=1e-4, atol=1e-5)), (loss_f32, ref)
    assert bool(jnp.allclose(loss_bf16, ref, rtol=5e-2, atol=1e-2)), (loss_bf16, ref)
    print("KERNEL_OK")
</pallas_src>

<mosaic_0001>
module attributes {stable_mosaic.version = 11 : i64} {
  func.func @_dsn_ce_kernel(%arg0: i32, %arg1: i32, %arg2: memref<1x8x8x8xf32, #tpu.memory_space<vmem>>, %arg3: memref<16x8xf32, #tpu.memory_space<vmem>>, %arg4: memref<8x128xf32, #tpu.memory_space<vmem>>, %arg5: memref<1x16x128xi32, #tpu.memory_space<vmem>>, %arg6: memref<1x16x128xf32, #tpu.memory_space<vmem>>, %arg7: memref<1x8x128xf32, #tpu.memory_space<vmem>>, %arg8: memref<2x8x512xf32, #tpu.memory_space<vmem>>) attributes {dimension_semantics = [#tpu.dimension_semantics<parallel>, #tpu.dimension_semantics<arbitrary>], iteration_bounds = array<i64: 2, 1>, scalar_prefetch = 0 : i64, scratch_operands = 1 : i64, tpu.core_type = #tpu.core_type<tc>, window_params = [{transform_indices = @transform_0, window_bounds = array<i64: 1, 8, 8, 8>}, {transform_indices = @transform_1, window_bounds = array<i64: 16, 8>}, {pipeline_mode = #tpu.pipeline_mode<synchronous>, transform_indices = @transform_2, window_bounds = array<i64: 8, 128>}, {transform_indices = @transform_3, window_bounds = array<i64: 1, 16, 128>}, {transform_indices = @transform_4, window_bounds = array<i64: 1, 16, 128>}, {transform_indices = @transform_5, window_bounds = array<i64: 1, 8, 128>}]} {
    %c0_i32 = arith.constant 0 : i32
    %0 = arith.cmpi eq, %arg1, %c0_i32 : i32
    %1 = arith.extui %0 : i1 to i32
    %c0_i32_0 = arith.constant 0 : i32
    %2 = arith.cmpi ne, %1, %c0_i32_0 : i32
    scf.if %2 {
      %cst_39 = arith.constant 0.000000e+00 : f32
      %122 = vector.broadcast %cst_39 : f32 to vector<1x16x128xf32>
      %c0_40 = arith.constant 0 : index
      %c0_41 = arith.constant 0 : index
      %c0_42 = arith.constant 0 : index
      %123 = vector.load %arg6[%c0_40, %c0_41, %c0_42] : memref<1x16x128xf32, #tpu.memory_space<vmem>>, vector<1x16x128xf32>
      tpu.vector_store %arg6[%c0_40, %c0_41, %c0_42], %122 {strides = array<i32>} : memref<1x16x128xf32, #tpu.memory_space<vmem>>, vector<1x16x128xf32>,
      %cst_43 = arith.constant 0.000000e+00 : f32
      %124 = vector.broadcast %cst_43 : f32 to vector<1x8x128xf32>
      %c0_44 = arith.constant 0 : index
      %c0_45 = arith.constant 0 : index
      %c0_46 = arith.constant 0 : index
      %125 = vector.load %arg7[%c0_44, %c0_45, %c0_46] : memref<1x8x128xf32, #tpu.memory_space<vmem>>, vector<1x8x128xf32>
      tpu.vector_store %arg7[%c0_44, %c0_45, %c0_46], %124 {strides = array<i32>} : memref<1x8x128xf32, #tpu.memory_space<vmem>>, vector<1x8x128xf32>,
      %c0_47 = arith.constant 0 : index
      %c0_48 = arith.constant 0 : index
      %126 = vector.load %arg4[%c0_47, %c0_48] : memref<8x128xf32, #tpu.memory_space<vmem>>, vector<8x128xf32>
      %c0_49 = arith.constant 0 : index
      %c0_50 = arith.constant 0 : index
      %c0_51 = arith.constant 0 : index
      %c0_52 = arith.constant 0 : index
      %127 = vector.load %arg2[%c0_49, %c0_50, %c0_51, %c0_52] : memref<1x8x8x8xf32, #tpu.memory_space<vmem>>, vector<1x1x8x8xf32>
      %128 = vector.shape_cast %127 : vector<1x1x8x8xf32> to vector<8x8xf32>
      %cst_53 = arith.constant dense<0.000000e+00> : vector<8x128xf32>
      %129 = tpu.matmul %128, %126, %cst_53 {dimension_numbers = #tpu.dot_dimension_numbers<[1], [0], [0], [1], [0, 0, 1, 1], [], []>} : vector<8x8xf32>, vector<8x128xf32>, vector<8x128xf32> -> vector<8x128xf32>
      %c0_54 = arith.constant 0 : index
      %c0_55 = arith.constant 0 : index
      %c0_56 = arith.constant 0 : index
      %130 = vector.load %arg8[%c0_54, %c0_55, %c0_56] : memref<2x8x512xf32, #tpu.memory_space<vmem>>, vector<1x8x128xf32>
      %131 = vector.shape_cast %130 : vector<1x8x128xf32> to vector<8x128xf32>
      %132 = vector.shape_cast %129 : vector<8x128xf32> to vector<1x8x128xf32>
      tpu.vector_store %arg8[%c0_54, %c0_55, %c0_56], %132 {strides = array<i32>} : memref<2x8x512xf32, #tpu.memory_space<vmem>>, vector<1x8x128xf32>,
      %c0_57 = arith.constant 0 : index
      %c1_58 = arith.constant 1 : index
      %c0_59 = arith.constant 0 : index
      %c0_60 = arith.constant 0 : index
      %133 = vector.load %arg2[%c0_57, %c1_58, %c0_59, %c0_60] : memref<1x8x8x8xf32, #tpu.memory_space<vmem>>, vector<1x1x8x8xf32>
      %134 = vector.shape_cast %133 : vector<1x1x8x8xf32> to vector<8x8xf32>
      %cst_61 = arith.constant dense<0.000000e+00> : vector<8x128xf32>
      %135 = tpu.matmul %134, %126, %cst_61 {dimension_numbers = #tpu.dot_dimension_numbers<[1], [0], [0], [1], [0, 0, 1, 1], [], []>} : vector<8x8xf32>, vector<8x128xf32>, vector<8x128xf32> -> vector<8x128xf32>
      %c0_62 = arith.constant 0 : index
      %c0_63 = arith.constant 0 : index
      %c128 = arith.constant 128 : index
      %136 = vector.load %arg8[%c0_62, %c0_63, %c128] : memref<2x8x512xf32, #tpu.memory_space<vmem>>, vector<1x8x128xf32>
      %137 = vector.shape_cast %136 : vector<1x8x128xf32> to vector<8x128xf32>
      %138 = vector.shape_cast %135 : vector<8x128xf32> to vector<1x8x128xf32>
      tpu.vector_store %arg8[%c0_62, %c0_63, %c128], %138 {strides = array<i32>} : memref<2x8x512xf32, #tpu.memory_space<vmem>>, vector<1x8x128xf32>,
      %c0_64 = arith.constant 0 : index
      %c2 = arith.constant 2 : index
      %c0_65 = arith.constant 0 : index
      %c0_66 = arith.constant 0 : index
      %139 = vector.load %arg2[%c0_64, %c2, %c0_65, %c0_66] : memref<1x8x8x8xf32, #tpu.memory_space<vmem>>, vector<1x1x8x8xf32>
      %140 = vector.shape_cast %139 : vector<1x1x8x8xf32> to vector<8x8xf32>
      %cst_67 = arith.constant dense<0.000000e+00> : vector<8x128xf32>
      %141 = tpu.matmul %140, %126, %cst_67 {dimension_numbers = #tpu.dot_dimension_numbers<[1], [0], [0], [1], [0, 0, 1, 1], [], []>} : vector<8x8xf32>, vector<8x128xf32>, vector<8x128xf32> -> vector<8x128xf32>
      %c0_68 = arith.constant 0 : index
      %c0_69 = arith.constant 0 : index
      %c256 = arith.constant 256 : index
      %142 = vector.load %arg8[%c0_68, %c0_69, %c256] : memref<2x8x512xf32, #tpu.memory_space<vmem>>, vector<1x8x128xf32>
      %143 = vector.shape_cast %142 : vector<1x8x128xf32> to vector<8x128xf32>
      %144 = vector.shape_cast %141 : vector<8x128xf32> to vector<1x8x128xf32>
      tpu.vector_store %arg8[%c0_68, %c0_69, %c256], %144 {strides = array<i32>} : memref<2x8x512xf32, #tpu.memory_space<vmem>>, vector<1x8x128xf32>,
      %c0_70 = arith.constant 0 : index
      %c3 = arith.constant 3 : index
      %c0_71 = arith.constant 0 : index
      %c0_72 = arith.constant 0 : index
      %145 = vector.load %arg2[%c0_70, %c3, %c0_71, %c0_72] : memref<1x8x8x8xf32, #tpu.memory_space<vmem>>, vector<1x1x8x8xf32>
      %146 = vector.shape_cast %145 : vector<1x1x8x8xf32> to vector<8x8xf32>
      %cst_73 = arith.constant dense<0.000000e+00> : vector<8x128xf32>
      %147 = tpu.matmul %146, %126, %cst_73 {dimension_numbers = #tpu.dot_dimension_numbers<[1], [0], [0], [1], [0, 0, 1, 1], [], []>} : vector<8x8xf32>, vector<8x128xf32>, vector<8x128xf32> -> vector<8x128xf32>
      %c0_74 = arith.constant 0 : index
      %c0_75 = arith.constant 0 : index
      %c384 = arith.constant 384 : index
      %148 = vector.load %arg8[%c0_74, %c0_75, %c384] : memref<2x8x512xf32, #tpu.memory_space<vmem>>, vector<1x8x128xf32>
      %149 = vector.shape_cast %148 : vector<1x8x128xf32> to vector<8x128xf32>
      %150 = vector.shape_cast %147 : vector<8x128xf32> to vector<1x8x128xf32>
      tpu.vector_store %arg8[%c0_74, %c0_75, %c384], %150 {strides = array<i32>} : memref<2x8x512xf32, #tpu.memory_space<vmem>>, vector<1x8x128xf32>,
      %c0_76 = arith.constant 0 : index
      %c4 = arith.constant 4 : index
      %c0_77 = arith.constant 0 : index
      %c0_78 = arith.constant 0 : index
      %151 = vector.load %arg2[%c0_76, %c4, %c0_77, %c0_78] : memref<1x8x8x8xf32, #tpu.memory_space<vmem>>, vector<1x1x8x8xf32>
      %152 = vector.shape_cast %151 : vector<1x1x8x8xf32> to vector<8x8xf32>
      %cst_79 = arith.constant dense<0.000000e+00> : vector<8x128xf32>
      %153 = tpu.matmul %152, %126, %cst_79 {dimension_numbers = #tpu.dot_dimension_numbers<[1], [0], [0], [1], [0, 0, 1, 1], [], []>} : vector<8x8xf32>, vector<8x128xf32>, vector<8x128xf32> -> vector<8x128xf32>
      %c1_80 = arith.constant 1 : index
      %c0_81 = arith.constant 0 : index
      %c0_82 = arith.constant 0 : index
      %154 = vector.load %arg8[%c1_80, %c0_81, %c0_82] : memref<2x8x512xf32, #tpu.memory_space<vmem>>, vector<1x8x128xf32>
      %155 = vector.shape_cast %154 : vector<1x8x128xf32> to vector<8x128xf32>
      %156 = vector.shape_cast %153 : vector<8x128xf32> to vector<1x8x128xf32>
      tpu.vector_store %arg8[%c1_80, %c0_81, %c0_82], %156 {strides = array<i32>} : memref<2x8x512xf32, #tpu.memory_space<vmem>>, vector<1x8x128xf32>,
      %c0_83 = arith.constant 0 : index
      %c5 = arith.constant 5 : index
      %c0_84 = arith.constant 0 : index
      %c0_85 = arith.constant 0 : index
      %157 = vector.load %arg2[%c0_83, %c5, %c0_84, %c0_85] : memref<1x8x8x8xf32, #tpu.memory_space<vmem>>, vector<1x1x8x8xf32>
      %158 = vector.shape_cast %157 : vector<1x1x8x8xf32> to vector<8x8xf32>
      %cst_86 = arith.constant dense<0.000000e+00> : vector<8x128xf32>
      %159 = tpu.matmul %158, %126, %cst_86 {dimension_numbers = #tpu.dot_dimension_numbers<[1], [0], [0], [1], [0, 0, 1, 1], [], []>} : vector<8x8xf32>, vector<8x128xf32>, vector<8x128xf32> -> vector<8x128xf32>
      %c1_87 = arith.constant 1 : index
      %c0_88 = arith.constant 0 : index
      %c128_89 = arith.constant 128 : index
      %160 = vector.load %arg8[%c1_87, %c0_88, %c128_89] : memref<2x8x512xf32, #tpu.memory_space<vmem>>, vector<1x8x128xf32>
      %161 = vector.shape_cast %160 : vector<1x8x128xf32> to vector<8x128xf32>
      %162 = vector.shape_cast %159 : vector<8x128xf32> to vector<1x8x128xf32>
      tpu.vector_store %arg8[%c1_87, %c0_88, %c128_89], %162 {strides = array<i32>} : memref<2x8x512xf32, #tpu.memory_space<vmem>>, vector<1x8x128xf32>,
      %c0_90 = arith.constant 0 : index
      %c6 = arith.constant 6 : index
      %c0_91 = arith.constant 0 : index
      %c0_92 = arith.constant 0 : index
      %163 = vector.load %arg2[%c0_90, %c6, %c0_91, %c0_92] : memref<1x8x8x8xf32, #tpu.memory_space<vmem>>, vector<1x1x8x8xf32>
      %164 = vector.shape_cast %163 : vector<1x1x8x8xf32> to vector<8x8xf32>
      %cst_93 = arith.constant dense<0.000000e+00> : vector<8x128xf32>
      %165 = tpu.matmul %164, %126, %cst_93 {dimension_numbers = #tpu.dot_dimension_numbers<[1], [0], [0], [1], [0, 0, 1, 1], [], []>} : vector<8x8xf32>, vector<8x128xf32>, vector<8x128xf32> -> vector<8x128xf32>
      %c1_94 = arith.constant 1 : index
      %c0_95 = arith.constant 0 : index
      %c256_96 = arith.constant 256 : index
      %166 = vector.load %arg8[%c1_94, %c0_95, %c256_96] : memref<2x8x512xf32, #tpu.memory_space<vmem>>, vector<1x8x128xf32>
      %167 = vector.shape_cast %166 : vector<1x8x128xf32> to vector<8x128xf32>
      %168 = vector.shape_cast %165 : vector<8x128xf32> to vector<1x8x128xf32>
      tpu.vector_store %arg8[%c1_94, %c0_95, %c256_96], %168 {strides = array<i32>} : memref<2x8x512xf32, #tpu.memory_space<vmem>>, vector<1x8x128xf32>,
      %c0_97 = arith.constant 0 : index
      %c7 = arith.constant 7 : index
      %c0_98 = arith.constant 0 : index
      %c0_99 = arith.constant 0 : index
      %169 = vector.load %arg2[%c0_97, %c7, %c0_98, %c0_99] : memref<1x8x8x8xf32, #tpu.memory_space<vmem>>, vector<1x1x8x8xf32>
      %170 = vector.shape_cast %169 : vector<1x1x8x8xf32> to vector<8x8xf32>
      %cst_100 = arith.constant dense<0.000000e+00> : vector<8x128xf32>
      %171 = tpu.matmul %170, %126, %cst_100 {dimension_numbers = #tpu.dot_dimension_numbers<[1], [0], [0], [1], [0, 0, 1, 1], [], []>} : vector<8x8xf32>, vector<8x128xf32>, vector<8x128xf32> -> vector<8x128xf32>
      %c1_101 = arith.constant 1 : index
      %c0_102 = arith.constant 0 : index
      %c384_103 = arith.constant 384 : index
      %172 = vector.load %arg8[%c1_101, %c0_102, %c384_103] : memref<2x8x512xf32, #tpu.memory_space<vmem>>, vector<1x8x128xf32>
      %173 = vector.shape_cast %172 : vector<1x8x128xf32> to vector<8x128xf32>
      %174 = vector.shape_cast %171 : vector<8x128xf32> to vector<1x8x128xf32>
      tpu.vector_store %arg8[%c1_101, %c0_102, %c384_103], %174 {strides = array<i32>} : memref<2x8x512xf32, #tpu.memory_space<vmem>>, vector<1x8x128xf32>,
    } else {
    }
    %c0 = arith.constant 0 : index
    %c0_1 = arith.constant 0 : index
    %3 = vector.load %arg3[%c0, %c0_1] : memref<16x8xf32, #tpu.memory_space<vmem>>, vector<16x8xf32>
    %c0_2 = arith.constant 0 : index
    %c0_3 = arith.constant 0 : index
    %c0_4 = arith.constant 0 : index
    %4 = vector.load %arg5[%c0_2, %c0_3, %c0_4] : memref<1x16x128xi32, #tpu.memory_space<vmem>>, vector<1x16x128xi32>
    %5 = vector.shape_cast %4 : vector<1x16x128xi32> to vector<16x128xi32>
    %c255_i32 = arith.constant 255 : i32
    %6 = vector.broadcast %c255_i32 : i32 to vector<16x128xi32>
    %7 = arith.cmpi ne, %5, %6 : vector<16x128xi32>
    %cst = arith.constant 1.000000e+00 : f32
    %cst_5 = arith.constant 0.000000e+00 : f32
    %8 = vector.broadcast %cst : f32 to vector<16x128xf32>
    %9 = vector.broadcast %cst_5 : f32 to vector<16x128xf32>
    %10 = arith.select %7, %8, %9 : vector<16x128xi1>, vector<16x128xf32>
    %11 = vector.extract_strided_slice %10 {offsets = [0, 0], sizes = [8, 128], strides = [1, 1]} : vector<16x128xf32> to vector<8x128xf32>
    %12 = vector.extract_strided_slice %10 {offsets = [8, 0], sizes = [8, 128], strides = [1, 1]} : vector<16x128xf32> to vector<8x128xf32>
    %13 = arith.addf %11, %12 : vector<8x128xf32>
    %c0_6 = arith.constant 0 : index
    %c0_7 = arith.constant 0 : index
    %c0_8 = arith.constant 0 : index
    %14 = vector.load %arg7[%c0_6, %c0_7, %c0_8] : memref<1x8x128xf32, #tpu.memory_space<vmem>>, vector<1x8x128xf32>
    %15 = vector.shape_cast %14 : vector<1x8x128xf32> to vector<8x128xf32>
    %16 = arith.addf %15, %13 : vector<8x128xf32>
    %c0_9 = arith.constant 0 : index
    %c0_10 = arith.constant 0 : index
    %c0_11 = arith.constant 0 : index
    %17 = vector.load %arg7[%c0_9, %c0_10, %c0_11] : memref<1x8x128xf32, #tpu.memory_space<vmem>>, vector<1x8x128xf32>
    %18 = vector.shape_cast %17 : vector<1x8x128xf32> to vector<8x128xf32>
    %19 = vector.shape_cast %16 : vector<8x128xf32> to vector<1x8x128xf32>
    tpu.vector_store %arg7[%c0_9, %c0_10, %c0_11], %19 {strides = array<i32>} : memref<1x8x128xf32, #tpu.memory_space<vmem>>, vector<1x8x128xf32>,
    %c0_12 = arith.constant 0 : index
    %c0_13 = arith.constant 0 : index
    %c0_14 = arith.constant 0 : index
    %20 = vector.load %arg8[%c0_12, %c0_13, %c0_14] : memref<2x8x512xf32, #tpu.memory_space<vmem>>, vector<1x8x512xf32>
    %21 = vector.shape_cast %20 : vector<1x8x512xf32> to vector<8x512xf32>
    %cst_15 = arith.constant dense<0.000000e+00> : vector<16x512xf32>
    %22 = tpu.matmul %3, %21, %cst_15 {dimension_numbers = #tpu.dot_dimension_numbers<[1], [0], [0], [1], [0, 0, 1, 1], [], []>} : vector<16x8xf32>, vector<8x512xf32>, vector<16x512xf32> -> vector<16x512xf32>
    %23 = vector.extract_strided_slice %22 {offsets = [0, 0], sizes = [16, 128], strides = [1, 1]} : vector<16x512xf32> to vector<16x128xf32>
    %c0_i32_16 = arith.constant 0 : i32
    %24 = vector.broadcast %c0_i32_16 : i32 to vector<16x128xi32>
    %25 = arith.cmpi eq, %5, %24 : vector<16x128xi32>
    %cst_17 = arith.constant 0.000000e+00 : f32
    %26 = vector.broadcast %cst_17 : f32 to vector<16x128xf32>
    %27 = arith.select %25, %23, %26 : vector<16x128xi1>, vector<16x128xf32>
    %28 = vector.extract_strided_slice %22 {offsets = [0, 128], sizes = [16, 128], strides = [1, 1]} : vector<16x512xf32> to vector<16x128xf32>
    %29 = arith.maximumf %23, %28 : vector<16x128xf32>
    %c1_i32 = arith.constant 1 : i32
    %30 = vector.broadcast %c1_i32 : i32 to vector<16x128xi32>
    %31 = arith.cmpi eq, %5, %30 : vector<16x128xi32>
    %32 = arith.select %31, %28, %27 : vector<16x128xi1>, vector<16x128xf32>
    %33 = vector.extract_strided_slice %22 {offsets = [0, 256], sizes = [16, 128], strides = [1, 1]} : vector<16x512xf32> to vector<16x128xf32>
    %34 = arith.maximumf %29, %33 : vector<16x128xf32>
    %c2_i32 = arith.constant 2 : i32
    %35 = vector.broadcast %c2_i32 : i32 to vector<16x128xi32>
    %36 = arith.cmpi eq, %5, %35 : vector<16x128xi32>
    %37 = arith.select %36, %33, %32 : vector<16x128xi1>, vector<16x128xf32>
    %38 = vector.extract_strided_slice %22 {offsets = [0, 384], sizes = [16, 128], strides = [1, 1]} : vector<16x512xf32> to vector<16x128xf32>
    %39 = arith.maximumf %34, %38 : vector<16x128xf32>
    %c3_i32 = arith.constant 3 : i32
    %40 = vector.broadcast %c3_i32 : i32 to vector<16x128xi32>
    %41 = arith.cmpi eq, %5, %40 : vector<16x128xi32>
    %42 = arith.select %41, %38, %37 : vector<16x128xi1>, vector<16x128xf32>
    %43 = arith.subf %23, %39 : vector<16x128xf32>
    %44 = math.exp %43 : vector<16x128xf32>
    %45 = vector.extract_strided_slice %22 {offsets = [0, 128], sizes = [16, 128], strides = [1, 1]} : vector<16x512xf32> to vector<16x128xf32>
    %46 = arith.subf %45, %39 : vector<16x128xf32>
    %47 = math.exp %46 : vector<16x128xf32>
    %48 = arith.addf %44, %47 : vector<16x128xf32>
    %49 = vector.extract_strided_slice %22 {offsets = [0, 256], sizes = [16, 128], strides = [1, 1]} : vector<16x512xf32> to vector<16x128xf32>
    %50 = arith.subf %49, %39 : vector<16x128xf32>
    %51 = math.exp %50 : vector<16x128xf32>
    %52 = arith.addf %48, %51 : vector<16x128xf32>
    %53 = vector.extract_strided_slice %22 {offsets = [0, 384], sizes = [16, 128], strides = [1, 1]} : vector<16x512xf32> to vector<16x128xf32>
    %54 = arith.subf %53, %39 : vector<16x128xf32>
    %55 = math.exp %54 : vector<16x128xf32>
    %56 = arith.addf %52, %55 : vector<16x128xf32>
    %57 = math.log %56 : vector<16x128xf32>
    %58 = arith.addf %39, %57 : vector<16x128xf32>
    %59 = arith.subf %58, %42 : vector<16x128xf32>
    %cst_18 = arith.constant 0.000000e+00 : f32
    %60 = vector.broadcast %cst_18 : f32 to vector<16x128xf32>
    %61 = arith.select %7, %59, %60 : vector<16x128xi1>, vector<16x128xf32>
    %62 = vector.extract_strided_slice %61 {offsets = [0, 0], sizes = [8, 128], strides = [1, 1]} : vector<16x128xf32> to vector<8x128xf32>
    %63 = vector.extract_strided_slice %61 {offsets = [8, 0], sizes = [8, 128], strides = [1, 1]} : vector<16x128xf32> to vector<8x128xf32>
    %64 = arith.addf %62, %63 : vector<8x128xf32>
    %c0_19 = arith.constant 0 : index
    %c0_20 = arith.constant 0 : index
    %c0_21 = arith.constant 0 : index
    %65 = vector.load %arg6[%c0_19, %c0_20, %c0_21] : memref<1x16x128xf32, #tpu.memory_space<vmem>>, vector<1x8x128xf32>
    %66 = vector.shape_cast %65 : vector<1x8x128xf32> to vector<8x128xf32>
    %67 = arith.addf %66, %64 : vector<8x128xf32>
    %c0_22 = arith.constant 0 : index
    %c0_23 = arith.constant 0 : index
    %c0_24 = arith.constant 0 : index
    %68 = vector.load %arg6[%c0_22, %c0_23, %c0_24] : memref<1x16x128xf32, #tpu.memory_space<vmem>>, vector<1x8x128xf32>
    %69 = vector.shape_cast %68 : vector<1x8x128xf32> to vector<8x128xf32>
    %70 = vector.shape_cast %67 : vector<8x128xf32> to vector<1x8x128xf32>
    tpu.vector_store %arg6[%c0_22, %c0_23, %c0_24], %70 {strides = array<i32>} : memref<1x16x128xf32, #tpu.memory_space<vmem>>, vector<1x8x128xf32>,
    %c1 = arith.constant 1 : index
    %c0_25 = arith.constant 0 : index
    %c0_26 = arith.constant 0 : index
    %71 = vector.load %arg8[%c1, %c0_25, %c0_26] : memref<2x8x512xf32, #tpu.memory_space<vmem>>, vector<1x8x512xf32>
    %72 = vector.shape_cast %71 : vector<1x8x512xf32> to vector<8x512xf32>
    %cst_27 = arith.constant dense<0.000000e+00> : vector<16x512xf32>
    %73 = tpu.matmul %3, %72, %cst_27 {dimension_numbers = #tpu.dot_dimension_numbers<[1], [0], [0], [1], [0, 0, 1, 1], [], []>} : vector<16x8xf32>, vector<8x512xf32>, vector<16x512xf32> -> vector<16x512xf32>
    %74 = vector.extract_strided_slice %73 {offsets = [0, 0], sizes = [16, 128], strides = [1, 1]} : vector<16x512xf32> to vector<16x128xf32>
    %c0_i32_28 = arith.constant 0 : i32
    %75 = vector.broadcast %c0_i32_28 : i32 to vector<16x128xi32>
    %76 = arith.cmpi eq, %5, %75 : vector<16x128xi32>
    %cst_29 = arith.constant 0.000000e+00 : f32
    %77 = vector.broadcast %cst_29 : f32 to vector<16x128xf32>
    %78 = arith.select %76, %74, %77 : vector<16x128xi1>, vector<16x128xf32>
    %79 = vector.extract_strided_slice %73 {offsets = [0, 128], sizes = [16, 128], strides = [1, 1]} : vector<16x512xf32> to vector<16x128xf32>
    %80 = arith.maximumf %74, %79 : vector<16x128xf32>
    %c1_i32_30 = arith.constant 1 : i32
    %81 = vector.broadcast %c1_i32_30 : i32 to vector<16x128xi32>
    %82 = arith.cmpi eq, %5, %81 : vector<16x128xi32>
    %83 = arith.select %82, %79, %78 : vector<16x128xi1>, vector<16x128xf32>
    %84 = vector.extract_strided_slice %73 {offsets = [0, 256], sizes = [16, 128], strides = [1, 1]} : vector<16x512xf32> to vector<16x128xf32>
    %85 = arith.maximumf %80, %84 : vector<16x128xf32>
    %c2_i32_31 = arith.constant 2 : i32
    %86 = vector.broadcast %c2_i32_31 : i32 to vector<16x128xi32>
    %87 = arith.cmpi eq, %5, %86 : vector<16x128xi32>
    %88 = arith.select %87, %84, %83 : vector<16x128xi1>, vector<16x128xf32>
    %89 = vector.extract_strided_slice %73 {offsets = [0, 384], sizes = [16, 128], strides = [1, 1]} : vector<16x512xf32> to vector<16x128xf32>
    %90 = arith.maximumf %85, %89 : vector<16x128xf32>
    %c3_i32_32 = arith.constant 3 : i32
    %91 = vector.broadcast %c3_i32_32 : i32 to vector<16x128xi32>
    %92 = arith.cmpi eq, %5, %91 : vector<16x128xi32>
    %93 = arith.select %92, %89, %88 : vector<16x128xi1>, vector<16x128xf32>
    %94 = arith.subf %74, %90 : vector<16x128xf32>
    %95 = math.exp %94 : vector<16x128xf32>
    %96 = vector.extract_strided_slice %73 {offsets = [0, 128], sizes = [16, 128], strides = [1, 1]} : vector<16x512xf32> to vector<16x128xf32>
    %97 = arith.subf %96, %90 : vector<16x128xf32>
    %98 = math.exp %97 : vector<16x128xf32>
    %99 = arith.addf %95, %98 : vector<16x128xf32>
    %100 = vector.extract_strided_slice %73 {offsets = [0, 256], sizes = [16, 128], strides = [1, 1]} : vector<16x512xf32> to vector<16x128xf32>
    %101 = arith.subf %100, %90 : vector<16x128xf32>
    %102 = math.exp %101 : vector<16x128xf32>
    %103 = arith.addf %99, %102 : vector<16x128xf32>
    %104 = vector.extract_strided_slice %73 {offsets = [0, 384], sizes = [16, 128], strides = [1, 1]} : vector<16x512xf32> to vector<16x128xf32>
    %105 = arith.subf %104, %90 : vector<16x128xf32>
    %106 = math.exp %105 : vector<16x128xf32>
    %107 = arith.addf %103, %106 : vector<16x128xf32>
    %108 = math.log %107 : vector<16x128xf32>
    %109 = arith.addf %90, %108 : vector<16x128xf32>
    %110 = arith.subf %109, %93 : vector<16x128xf32>
    %cst_33 = arith.constant 0.000000e+00 : f32
    %111 = vector.broadcast %cst_33 : f32 to vector<16x128xf32>
    %112 = arith.select %7, %110, %111 : vector<16x128xi1>, vector<16x128xf32>
    %113 = vector.extract_strided_slice %112 {offsets = [0, 0], sizes = [8, 128], strides = [1, 1]} : vector<16x128xf32> to vector<8x128xf32>
    %114 = vector.extract_strided_slice %112 {offsets = [8, 0], sizes = [8, 128], strides = [1, 1]} : vector<16x128xf32> to vector<8x128xf32>
    %115 = arith.addf %113, %114 : vector<8x128xf32>
    %c0_34 = arith.constant 0 : index
    %c8 = arith.constant 8 : index
    %c0_35 = arith.constant 0 : index
    %116 = vector.load %arg6[%c0_34, %c8, %c0_35] : memref<1x16x128xf32, #tpu.memory_space<vmem>>, vector<1x8x128xf32>
    %117 = vector.shape_cast %116 : vector<1x8x128xf32> to vector<8x128xf32>
    %118 = arith.addf %117, %115 : vector<8x128xf32>
    %c0_36 = arith.constant 0 : index
    %c8_37 = arith.constant 8 : index
    %c0_38 = arith.constant 0 : index
    %119 = vector.load %arg6[%c0_36, %c8_37, %c0_38] : memref<1x16x128xf32, #tpu.memory_space<vmem>>, vector<1x8x128xf32>
    %120 = vector.shape_cast %119 : vector<1x8x128xf32> to vector<8x128xf32>
    %121 = vector.shape_cast %118 : vector<8x128xf32> to vector<1x8x128xf32>
    tpu.vector_store %arg6[%c0_36, %c8_37, %c0_38], %121 {strides = array<i32>} : memref<1x16x128xf32, #tpu.memory_space<vmem>>, vector<1x8x128xf32>,
    return
  }
  func.func @transform_0(%arg0: i32, %arg1: i32) -> (i32, i32, i32, i32) {
    %c0_i32 = arith.constant 0 : i32
    %c0_i32_0 = arith.constant 0 : i32
    %c0_i32_1 = arith.constant 0 : i32
    %c0_i32_2 = arith.constant 0 : i32
    return %arg0, %c0_i32, %c0_i32_0, %c0_i32_1 : i32, i32, i32, i32
  }
  func.func @transform_1(%arg0: i32, %arg1: i32) -> (i32, i32) {
    %c0_i32 = arith.constant 0 : i32
    %c0_i32_0 = arith.constant 0 : i32
    return %arg1, %c0_i32 : i32, i32
  }
  func.func @transform_2(%arg0: i32, %arg1: i32) -> (i32, i32) {
    %c0_i32 = arith.constant 0 : i32
    %c0_i32_0 = arith.constant 0 : i32
    %c0_i32_1 = arith.constant 0 : i32
    return %c0_i32, %c0_i32_0 : i32, i32
  }
  func.func @transform_3(%arg0: i32, %arg1: i32) -> (i32, i32, i32) {
    %c0_i32 = arith.constant 0 : i32
    %c0_i32_0 = arith.constant 0 : i32
    return %arg0, %arg1, %c0_i32 : i32, i32, i32
  }
  func.func @transform_4(%arg0: i32, %arg1: i32) -> (i32, i32, i32) {
    %c0_i32 = arith.constant 0 : i32
    %c0_i32_0 = arith.constant 0 : i32
    %c0_i32_1 = arith.constant 0 : i32
    return %arg0, %c0_i32, %c0_i32_0 : i32, i32, i32
  }
  func.func @transform_5(%arg0: i32, %arg1: i32) -> (i32, i32, i32) {
    %c0_i32 = arith.constant 0 : i32
    %c0_i32_0 = arith.constant 0 : i32
    %c0_i32_1 = arith.constant 0 : i32
    return %arg0, %c0_i32, %c0_i32_0 : i32, i32, i32
  }
}

</mosaic_0001>

<bundles_post_ra>
// kernel: criterion_dsn.1
= control target key start
LH: loop header
LB: loop body
LE: loop exit
PB: predicated region body
PF: predicated region fallthrough
CT: control target
= control target key end

     0   :  { %s1730_s18 = smov 0   ;;  %s1732_s19 = smov 0   ;;  %s2003_s0 = inlined_call_operand.vmem [shape: f32[2,8,8,8], index: 0, kind: input, shape index: {}]   ;;  %s2004_s1 = inlined_call_operand.vmem [shape: f32[16,8], index: 1, kind: input, shape index: {}]   ;;  %s2005_s2 = inlined_call_operand.vmem [shape: f32[8,128], index: 2, kind: input, shape index: {}]   ;;  %s2006_s3 = inlined_call_operand.vmem [shape: s32[2,16,128], index: 3, kind: input, shape index: {}]   ;;  %s2007_s4 = inlined_call_operand.vmem [shape: f32[2,16,128], index: 4, kind: output, shape index: {0}]   ;;  %s2008_s5 = inlined_call_operand.vmem [shape: f32[2,8,128], index: 5, kind: output, shape index: {1}]  }
   0x1   :  { %s1734_s20 = smov 0  }
   0x2 LB: > { %s28_s21 = sadd.s32 1, %s1692_s19  ;;  %p1516_p0 = scmp.ge.s32.totalorder %s1696_s20, 1  ;;  %s1696_s20 = sphi %s1734_s20, %s16_s20   ;;  %s1692_s19 = sphi %s1732_s19, %s2010_s19   ;;  %s1688_s18 = sphi %s1730_s18, %s2009_s18  }
   0x3   : > { %p30_p1 = scmp.ge.s32.totalorder %s28_s21, 2  ;;  %p230_p2 = scmp.lt.s32.totalorder %s1696_s20, 3 }
   0x5   : > { %s2012_s21 = smov (%p30_p1, %s28_s21), 0  ;;  %p231_p3 = pnand %p1516_p0, %p230_p2 }
   0x6   : > { %p276_p4 = scmp.lt.s32.totalorder (!%p231_p3), %s1688_s18, 1 }
   0x7   : > { %234 = sbr.rel (%p231_p3) target bundleno = 475 (0x1db), region = 36 }
   0xc   : > { %v313_v0 = vld [vmem:[%s2005_s2] sm:$0xff]  ;;  %v1698_v1 = vmov 0.0   ;;  %vm1699_vm0 = vmmov 0   ;;  %s2014_s18 = smov (!%p276_p4, %s1688_s18), 1  ;;  %vm315_vm1 = vcmask 64512   ;;  %v924_v17 = vld [vmem:[%s2004_s1 + $0x8] sm:$0xff] }
   0xd   : > { %1568 = vmatprep.subr.mxu0 %v1698_v1  ;;  %1573 = vmatprep.subr.mxu1 %v1698_v1  ;;  %s1549_s24 = sshll.u32 %s2014_s18, 6  ;;  %v923_v12 = vld [vmem:[%s2004_s1] sm:$0xff]  ;;  %s1550_s7 = sshll.u32 %s2014_s18, 4 }
   0xe   : > { %1569 = vmatpush3.msra.mxu0 %v313_v0  ;;  %1570 = vmatprep.mubr.msk.f32.mxu0 %vm1699_vm0, %v1698_v1  ;;  %s280_s27 = scalar_lea.vmem %s2003_s0, %s1549_s24  ;;  %s295_s10 = scalar_lea.vmem %s2006_s3, %s1550_s7 }
   0xf   : > { %1574 = vmatpush3.msra.mxu1 %v313_v0  ;;  %1575 = vmatprep.mubr.msk.f32.mxu1 %vm1699_vm0, %v1698_v1  ;;  %v314_v2 = vld [vmem:[%s280_s27] sm:$0xff]  ;;  %v1525_v3 = vld [vmem:[%s280_s27 + $0x8] sm:$0xff]  ;;  %v1527_v4 = vld [vmem:[%s280_s27 + $0x10] sm:$0xff]  ;;  %s1523_s11 = sshll.u32 %s2014_s18, 3  ;;  %s301_s17 = scalar_lea.vmem %s2007_s4, %s1550_s7 }
  0x10   : > { %1578 = vmatprep.subr.mxu0 %v1698_v1  ;;  %1583 = vmatprep.subr.mxu1 %v1698_v1  ;;  %v1529_v5 = vld [vmem:[%s280_s27 + $0x18] sm:$0xff]  ;;  %v1531_v6 = vld [vmem:[%s280_s27 + $0x20] sm:$0xff]  ;;  %v1533_v7 = vld [vmem:[%s280_s27 + $0x28] sm:$0xff]  ;;  %s305_s14 = scalar_lea.vmem %s2008_s5, %s1523_s11 }
  0x11   : > { %1571 = vmatmul.mubr.msk.f32.vlgmr.msra.gmra.mxu0 %vm315_vm1, %v314_v2  ;;  %1576 = vmatmul.mubr.msk.f32.vlgmr.msra.gmra.mxu1 %vm315_vm1, %v1525_v3  ;;  %v1535_v8 = vld [vmem:[%s280_s27 + $0x30] sm:$0xff]  ;;  %v1537_v9 = vld [vmem:[%s280_s27 + $0x38] sm:$0xff]  ;;  %v1817_v28 = vld [vmem:[%s295_s10] sm:$0xff] }
  0x12   : > { %1579 = vmatpush3.msra.mxu0 %v313_v0  ;;  %1580 = vmatprep.mubr.msk.f32.mxu0 %vm1699_vm0, %v1698_v1  ;;  %vm927_vm2 = vcmp.ne.s32.totalorder %v1817_v28, 255  ;;  %v1820_v29 = vld [vmem:[%s295_s10 + $0x8] sm:$0xff]  ;;  %vm1100_vm4 = vcmp.eq.s32.totalorder %v1817_v28, 0  ;;  %vm1106_vm6 = vcmp.eq.s32.totalorder %v1817_v28, 1  ;;  %vm1112_vm8 = vcmp.eq.s32.totalorder %v1817_v28, 2 }
  0x13   : > { %1584 = vmatpush3.msra.mxu1 %v313_v0  ;;  %1585 = vmatprep.mubr.msk.f32.mxu1 %vm1699_vm0, %v1698_v1  ;;  %v929_v30 = vsel %vm927_vm2, 1.0, %v1698_v1  ;;  %vm928_vm3 = vcmp.ne.s32.totalorder %v1820_v29, 255  ;;  %vm1101_vm5 = vcmp.eq.s32.totalorder %v1820_v29, 0  ;;  %vm1107_vm7 = vcmp.eq.s32.totalorder %v1820_v29, 1 }
  0x14   : > { %1588 = vmatprep.subr.mxu0 %v1698_v1  ;;  %1593 = vmatprep.subr.mxu1 %v1698_v1  ;;  %v930_v31 = vsel %vm928_vm3, 1.0, %v1698_v1  ;;  %vm1113_vm9 = vcmp.eq.s32.totalorder %v1820_v29, 2  ;;  %vm1118_vm10 = vcmp.eq.s32.totalorder %v1817_v28, 3  ;;  %vm1119_vm11 = vcmp.eq.s32.totalorder %v1820_v29, 3 }
  0x15   : > { %1581 = vmatmul.mubr.msk.f32.vlgmr.msra.gmra.mxu0 %vm315_vm1, %v1527_v4  ;;  %1586 = vmatmul.mubr.msk.f32.vlgmr.msra.gmra.mxu1 %vm315_vm1, %v1529_v5  ;;  %v931_v32 = vadd.f32 %v930_v31, %v929_v30 }
  0x16   : > { %1589 = vmatpush3.msra.mxu0 %v313_v0  ;;  %1590 = vmatprep.mubr.msk.f32.mxu0 %vm1699_vm0, %v1698_v1 }
  0x17   : > { %1594 = vmatpush3.msra.mxu1 %v313_v0  ;;  %1595 = vmatprep.mubr.msk.f32.mxu1 %vm1699_vm0, %v1698_v1  ;;  %934 = vst [vmem:[%s305_s14] sm:$0xff] %v931_v32 }
  0x18   : > { %1598 = vmatprep.subr.mxu0 %v1698_v1  ;;  %1603 = vmatprep.subr.mxu1 %v1698_v1 }
  0x19   : > { %1591 = vmatmul.mubr.msk.f32.vlgmr.msra.gmra.mxu0 %vm315_vm1, %v1531_v6  ;;  %1596 = vmatmul.mubr.msk.f32.vlgmr.msra.gmra.mxu1 %vm315_vm1, %v1533_v7 }
  0x1a   : > { %1599 = vmatpush3.msra.mxu0 %v313_v0  ;;  %1600 = vmatprep.mubr.msk.f32.mxu0 %vm1699_vm0, %v1698_v1 }
  0x1b   : > { %1604 = vmatpush3.msra.mxu1 %v313_v0  ;;  %1605 = vmatprep.mubr.msk.f32.mxu1 %vm1699_vm0, %v1698_v1 }
  0x1d   : > { %1601 = vmatmul.mubr.msk.f32.vlgmr.msra.gmra.mxu0 %vm315_vm1, %v1535_v8  ;;  %1606 = vmatmul.mubr.msk.f32.vlgmr.msra.gmra.mxu1 %vm315_vm1, %v1537_v9 }
  0x1e   : > { %1010 = vmatprep.mubr.f32.mxu0 %v1698_v1  ;;  %1087 = vmatprep.mubr.f32.mxu1 %v1698_v1 }
  0xd1   : > { %v385_v10 = vpop.f32.mrf.mxu0  ;;  %v461_v11 = vpop.f32.mrf.mxu1 }
  0xd2   : > { %976 = vmatprep.subr.mxu0 %v461_v11 }
  0xd3   : > { %v1572_v13 = vpop.f32.mrf.mxu0  ;;  %v1577_v14 = vpop.f32.mrf.mxu1  ;;  %977 = vmatpush1.msra.mxu0 %v385_v10 }
  0xd4   : > { %1539 = vmatmul.mubr.msk.f32.vlgmr.msra.gmra.mxu0 %vm315_vm1, %v923_v12 }
  0xd5   : > { %v537_v15 = vpop.f32.mrf.mxu0  ;;  %v613_v16 = vpop.f32.mrf.mxu1  ;;  %1016 = vmatprep.mubr.f32.mxu0 %v1698_v1 }
  0xd6   : > { %1053 = vmatprep.subr.mxu1 %v613_v16 }
  0xd7   : > { %v1582_v18 = vpop.f32.mrf.mxu0  ;;  %v1587_v19 = vpop.f32.mrf.mxu1  ;;  %1054 = vmatpush1.msra.mxu1 %v537_v15 }
  0xd8   : > { %1540 = vmatmul.mubr.msk.f32.gmra.mxu0 %vm315_vm1, %v924_v17  ;;  %1541 = vmatmul.mubr.msk.f32.vlgmr.msra.gmra.mxu1 %vm315_vm1, %v923_v12 }
  0xd9   : > { %v689_v20 = vpop.f32.mrf.mxu0  ;;  %v766_v21 = vpop.f32.mrf.mxu1  ;;  %1093 = vmatprep.mubr.f32.mxu1 %v1698_v1  ;;  %1235 = vmatprep.mubr.f32.mxu0 %v1698_v1 }
  0xda   : > { %1201 = vmatprep.subr.mxu0 %v766_v21 }
  0xdb   : > { %v1592_v22 = vpop.f32.mrf.mxu0  ;;  %v1597_v23 = vpop.f32.mrf.mxu1  ;;  %1202 = vmatpush1.msra.mxu0 %v689_v20 }
  0xdc   : > { %1542 = vmatmul.mubr.msk.f32.gmra.mxu1 %vm315_vm1, %v924_v17  ;;  %1543 = vmatmul.mubr.msk.f32.vlgmr.msra.gmra.mxu0 %vm315_vm1, %v923_v12 }
  0xdd   : > { %v842_v24 = vpop.f32.mrf.mxu0  ;;  %v918_v25 = vpop.f32.mrf.mxu1  ;;  %1241 = vmatprep.mubr.f32.mxu0 %v1698_v1  ;;  %1312 = vmatprep.mubr.f32.mxu1 %v1698_v1 }
  0xde   : > { %1278 = vmatprep.subr.mxu1 %v918_v25 }
  0xdf   : > { %v1602_v26 = vpop.f32.mrf.mxu0  ;;  %v1607_v27 = vpop.f32.mrf.mxu1  ;;  %1279 = vmatpush1.msra.mxu1 %v842_v24 }
  0xe0   : > { %1544 = vmatmul.mubr.msk.f32.gmra.mxu0 %vm315_vm1, %v924_v17  ;;  %1545 = vmatmul.mubr.msk.f32.vlgmr.msra.gmra.mxu1 %vm315_vm1, %v923_v12 }
  0xe1   : > { %1318 = vmatprep.mubr.f32.mxu1 %v1698_v1 }
  0xe4   : > { %1546 = vmatmul.mubr.msk.f32.gmra.mxu1 %vm315_vm1, %v924_v17 }
 0x194   : > { %v1833_v33 = vpop.f32.mrf.mxu0 }
 0x196   : > { %v1835_v34 = vpop.f32.mrf.mxu0 }
 0x197   : > { %v1104_v35 = vmax.f32 %v1833_v33, %v1835_v34 }
 0x198   : > { %v1839_v36 = vpop.f32.mrf.mxu0  ;;  %v1841_v37 = vpop.f32.mrf.mxu1 }
 0x199   : > { %v1110_v38 = vmax.f32 %v1104_v35, %v1841_v37 }
 0x19a   : > { %v1844_v39 = vpop.f32.mrf.mxu0  ;;  %v1846_v40 = vpop.f32.mrf.mxu1 }
 0x19b   : > { %v1105_v41 = vmax.f32 %v1839_v36, %v1844_v39  ;;  %v1851_v42 = vmax.f32 %v1110_v38, %v1846_v40 }
 0x19c   : > { %v1853_v43 = vpop.f32.mrf.mxu1  ;;  %v1855_v44 = vpop.f32.mrf.mxu0 }
 0x19d   : > { %v1122_v45 = vsub.f32 %v1833_v33, %v1851_v42  ;;  %v1128_v46 = vsub.f32 %v1835_v34, %v1851_v42  ;;  %v1136_v47 = vsub.f32 %v1841_v37, %v1851_v42  ;;  %v1144_v48 = vsub.f32 %v1846_v40, %v1851_v42 }
 0x19e   : > { %v1111_v49 = vmax.f32 %v1105_v41, %v1853_v43  ;;  %v1866_v50 = vpop.f32.mrf.mxu1  ;;  %v1868_v51 = vpop.f32.mrf.mxu0 }
 0x19f   : > { %v1124_v52 = vmul.f32 1.442695, %v1122_v45  ;;  %v1130_v53 = vmul.f32 1.442695, %v1128_v46  ;;  %v1138_v54 = vmul.f32 1.442695, %v1136_v47  ;;  %v1327_v56 = vmax.f32 %v1855_v44, %v1868_v51 }
 0x1a0   : > { %v1871_v55 = vmax.f32 %v1111_v49, %v1866_v50  ;;  %v1875_v57 = vpop.f32.mrf.mxu0  ;;  %v1877_v58 = vpop.f32.mrf.mxu1  ;;  %v1146_v59 = vmul.f32 1.442695, %v1144_v48 }
 0x1a1   : > { %1634 = vpow2.f32 %v1124_v52  ;;  %v1331_v2 = vmax.f32 %v1327_v56, %v1877_v58 }
 0x1a2   : > { %1636 = vpow2.f32 %v1130_v53  ;;  %v1123_v60 = vsub.f32 %v1839_v36, %v1871_v55  ;;  %v1129_v61 = vsub.f32 %v1844_v39, %v1871_v55  ;;  %v1137_v62 = vsub.f32 %v1853_v43, %v1871_v55  ;;  %v1885_v63 = vpop.f32.mrf.mxu0  ;;  %v1887_v0 = vpop.f32.mrf.mxu1 }
 0x1a3   : > { %v1145_v1 = vsub.f32 %v1866_v50, %v1871_v55  ;;  %v1328_v3 = vmax.f32 %v1875_v57, %v1885_v63  ;;  %1638 = vpow2.f32 %v1138_v54  ;;  %v1897_v9 = vmax.f32 %v1331_v2, %v1887_v0 }
 0x1a4   : > { %v1126_v4 = vmul.f32 1.442695, %v1123_v60  ;;  %v1132_v5 = vmul.f32 1.442695, %v1129_v61  ;;  %v1140_v6 = vmul.f32 1.442695, %v1137_v62  ;;  %v1894_v7 = vpop.f32.mrf.mxu1  ;;  %1640 = vpow2.f32 %v1146_v59 }
 0x1a5   : > { %v1148_v8 = vmul.f32 1.442695, %v1145_v1  ;;  %v1332_v10 = vmax.f32 %v1328_v3, %v1894_v7  ;;  %v1339_v12 = vsub.f32 %v1855_v44, %v1897_v9  ;;  %v1345_v13 = vsub.f32 %v1868_v51, %v1897_v9 }
 0x1a6   : > { %1642 = vpow2.f32 %v1126_v4  ;;  %v1900_v11 = vpop.f32.mrf.mxu1  ;;  %v1353_v14 = vsub.f32 %v1877_v58, %v1897_v9  ;;  %v1361_v15 = vsub.f32 %v1887_v0, %v1897_v9 }
 0x1a7   : > { %1644 = vpow2.f32 %v1132_v5  ;;  %v1911_v16 = vmax.f32 %v1332_v10, %v1900_v11  ;;  %v1341_v17 = vmul.f32 1.442695, %v1339_v12  ;;  %v1347_v18 = vmul.f32 1.442695, %v1345_v13 }
 0x1a8   : > { %1646 = vpow2.f32 %v1140_v6  ;;  %v1355_v19 = vmul.f32 1.442695, %v1353_v14  ;;  %v1363_v20 = vmul.f32 1.442695, %v1361_v15  ;;  %v1102_v13 = vsel %vm1100_vm4, %v1833_v33, 0.0 }
 0x1a9   : > { %1648 = vpow2.f32 %v1148_v8  ;;  %v1340_v21 = vsub.f32 %v1875_v57, %v1911_v16  ;;  %v1346_v22 = vsub.f32 %v1885_v63, %v1911_v16  ;;  %v1354_v23 = vsub.f32 %v1894_v7, %v1911_v16 }
 0x1aa   : > { %1650 = vpow2.f32 %v1341_v17  ;;  %v1362_v26 = vsub.f32 %v1900_v11, %v1911_v16  ;;  %v1103_v17 = vsel %vm1101_vm5, %v1839_v36, 0.0 }
 0x1ab   : > { %1652 = vpow2.f32 %v1347_v18  ;;  %v1343_v24 = vmul.f32 1.442695, %v1340_v21  ;;  %v1349_v25 = vmul.f32 1.442695, %v1346_v22  ;;  %v1357_v30 = vmul.f32 1.442695, %v1354_v23 }
 0x1ac   : > { %1654 = vpow2.f32 %v1355_v19  ;;  %v1365_v35 = vmul.f32 1.442695, %v1362_v26  ;;  %v1108_v18 = vsel %vm1106_vm6, %v1835_v34, %v1102_v13  ;;  %v1109_v33 = vsel %vm1107_vm7, %v1844_v39, %v1103_v17 }
 0x1ad   : > { %1656 = vpow2.f32 %v1363_v20  ;;  %v1114_v36 = vsel %vm1112_vm8, %v1841_v37, %v1108_v18  ;;  %v1115_v34 = vsel %vm1113_vm9, %v1853_v43, %v1109_v33  ;;  %v1325_v37 = vsel %vm1100_vm4, %v1855_v44, 0.0 }
 0x1ae   : > { %v1635_v27 = vpop.eup %1634  ;;  %1658 = vpow2.f32 %v1343_v24  ;;  %v1120_v39 = vsel %vm1118_vm10, %v1846_v40, %v1114_v36  ;;  %v1121_v24 = vsel %vm1119_vm11, %v1866_v50, %v1115_v34  ;;  %v1326_v43 = vsel %vm1101_vm5, %v1875_v57, 0.0 }
 0x1af   : > { %v1637_v31 = vpop.eup %1636  ;;  %1660 = vpow2.f32 %v1349_v25  ;;  %v1329_v40 = vsel %vm1106_vm6, %v1868_v51, %v1325_v37  ;;  %v1330_v50 = vsel %vm1107_vm7, %v1885_v63, %v1326_v43 }
 0x1b0   : > { %v1134_v32 = vadd.f32 %v1637_v31, %v1635_v27  ;;  %v1639_v38 = vpop.eup %1638  ;;  %1662 = vpow2.f32 %v1357_v30  ;;  %v1333_v57 = vsel %vm1112_vm8, %v1877_v58, %v1329_v40  ;;  %v1334_v51 = vsel %vm1113_vm9, %v1894_v7, %v1330_v50 }
 0x1b1   : > { %v1641_v41 = vpop.eup %1640  ;;  %1664 = vpow2.f32 %v1365_v35  ;;  %v1337_v63 = vsel %vm1118_vm10, %v1887_v0, %v1333_v57 }
 0x1b2   : > { %v1142_v45 = vadd.f32 %v1639_v38, %v1134_v32 }
 0x1b3   : > { %v1643_v46 = vpop.eup %1642 }
 0x1b4   : > { %v1645_v47 = vpop.eup %1644  ;;  %v1150_v48 = vadd.f32 %v1641_v41, %v1142_v45 }
 0x1b5   : > { %v1647_v49 = vpop.eup %1646  ;;  %v1135_v52 = vadd.f32 %v1645_v47, %v1643_v46 }
 0x1b6   : > { %v1649_v53 = vpop.eup %1648  ;;  %1666 = vlog2.f32 %v1150_v48 }
 0x1b7   : > { %v1143_v54 = vadd.f32 %v1647_v49, %v1135_v52  ;;  %v1651_v56 = vpop.eup %1650 }
 0x1b8   : > { %v1653_v59 = vpop.eup %1652 }
 0x1b9   : > { %v1151_v60 = vadd.f32 %v1649_v53, %v1143_v54  ;;  %v1655_v61 = vpop.eup %1654  ;;  %v1351_v62 = vadd.f32 %v1653_v59, %v1651_v56 }
 0x1ba   : > { %v1657_v1 = vpop.eup %1656 }
 0x1bb   : > { %1668 = vlog2.f32 %v1151_v60  ;;  %v1659_v2 = vpop.eup %1658  ;;  %v1359_v3 = vadd.f32 %v1655_v61, %v1351_v62 }
 0x1bc   : > { %v1661_v4 = vpop.eup %1660 }
 0x1bd   : > { %v1367_v5 = vadd.f32 %v1657_v1, %v1359_v3  ;;  %v1352_v6 = vadd.f32 %v1661_v4, %v1659_v2  ;;  %v1663_v8 = vpop.eup %1662 }
 0x1be   : > { %v1665_v12 = vpop.eup %1664 }
 0x1bf   : > { %1670 = vlog2.f32 %v1367_v5  ;;  %v1360_v10 = vadd.f32 %v1663_v8, %v1352_v6 }
 0x1c1   : > { %v1368_v14 = vadd.f32 %v1665_v12, %v1360_v10 }
 0x1c3   : > { %v1667_v15 = vpop.eup %1666  ;;  %1672 = vlog2.f32 %v1368_v14 }
 0x1c4   : > { %v1153_v19 = vmul.f32 0.6931472, %v1667_v15 }
 0x1c6   : > { %v1156_v20 = vadd.f32 %v1153_v19, %v1851_v42 }
 0x1c8   : > { %v1669_v21 = vpop.eup %1668  ;;  %v1158_v23 = vsub.f32 %v1156_v20, %v1120_v39 }
 0x1c9   : > { %v1155_v22 = vmul.f32 0.6931472, %v1669_v21 }
 0x1ca   : > { %v1160_v44 = vsel %vm927_vm2, %v1158_v23, 0.0 }
 0x1cb   : > { %v1157_v42 = vadd.f32 %v1155_v22, %v1871_v55 }
 0x1cc   : > { %v1671_v25 = vpop.eup %1670 }
 0x1cd   : > { %v1159_v26 = vsub.f32 %v1157_v42, %v1121_v24  ;;  %v1370_v27 = vmul.f32 0.6931472, %v1671_v25 }
 0x1cf   : > { %v1161_v55 = vsel %vm928_vm3, %v1159_v26, 0.0  ;;  %v1373_v31 = vadd.f32 %v1370_v27, %v1897_v9  ;;  %v1338_v9 = vsel %vm1119_vm11, %v1900_v11, %v1334_v51 }
 0x1d0   : > { %v1162_v30 = vadd.f32 %v1161_v55, %v1160_v44  ;;  %v1673_v32 = vpop.eup %1672 }
 0x1d1   : > { %v1372_v35 = vmul.f32 0.6931472, %v1673_v32  ;;  %v1375_v38 = vsub.f32 %v1373_v31, %v1337_v63 }
 0x1d2   : > { %1165 = vst [vmem:[%s301_s17] sm:$0xff] %v1162_v30 }
 0x1d3   : > { %v1374_v58 = vadd.f32 %v1372_v35, %v1911_v16  ;;  %v1377_v45 = vsel %vm927_vm2, %v1375_v38, 0.0 }
 0x1d5   : > { %v1376_v41 = vsub.f32 %v1374_v58, %v1338_v9 }
 0x1d7   : > { %v1378_v7 = vsel %vm928_vm3, %v1376_v41, 0.0 }
 0x1d8   : > { %v1379_v46 = vadd.f32 %v1378_v7, %v1377_v45 }
 0x1da   : > { %1382 = vst [vmem:[%s301_s17 + $0x8] sm:$0xff] %v1379_v46 }
 0x1db PF: > { %s16_s20 = sadd.s32 1, %s1696_s20   ;;  %s2009_s18 = smov %s1692_s19 }
 0x1dc   : > { %p13_p5 = scmp.ge.s32.totalorder %s16_s20, 4   ;;  %s2010_s19 = smov %s2012_s21 }
 0x1de   :  { %15 = sbr.rel (!%p13_p5) target bundleno = 2 (0x2), region = 97 }

</bundles_post_ra>
